<compile_context>
chip_gen: v5e
topology: v5e:2x2
jax: 0.10.0
libtpu: 0.0.40
codegen_flags: <defaults>
</compile_context>

<pallas_src>
import jax
import jax.numpy as jnp
from jax.experimental import pallas as pl
from jax.experimental.pallas import tpu as pltpu


TN_MAX = 2048  # item tile (lanes); bf16 block = 2E*tn*2B = 256 KiB at tn=2048


def _round_up(x, m):
    return ((x + m - 1) // m) * m


def _neumf_kernel(hw_ref, items_ref, wcomb_ref, out_ref):
    # hw_ref:    (1, H, 2)    per-batch columns: [:,0]=h_u (user half of
    #                         mlp[0] + bias), [:,1]=wp_mlp (prediction weights)
    # items_ref: (1, 2E, tn)  lane-major item tile (bf16): rows 0..E-1=mlp_i^T,
    #                         rows E..2E-1 = mf_i^T
    # wcomb_ref: (1, H+1, 2E) per-batch combined weight (bf16):
    #                         rows 0..H-1 = [w1i^T | 0], row H = [0 | mf_u*wp_mf]
    # out_ref:   (1, 1, tn)   lane-dense prediction row
    H = hw_ref.shape[1]

    items = items_ref[0]                       # (2E, tn)  bf16
    w = wcomb_ref[0]                           # (H+1, 2E) bf16

    # One MXU op gives both the MLP hidden pre-activation and the MF-branch
    # prediction, accumulated in f32.
    r = jnp.dot(w, items, preferred_element_type=jnp.float32)   # (H+1, tn) f32
    z = r[:H, :]                               # (H, tn)
    pred_mf = r[H:H + 1, :]                    # (1, tn)

    hw = hw_ref[0]                             # (H, 2) f32
    h_u = hw[:, 0:1]                           # (H, 1)
    wp_mlp = hw[:, 1:2]                        # (H, 1)

    # relu(mlp_vec @ W1 + b1); dropout(p=0.2) is identity in eval mode.
    h = jnp.maximum(z + h_u, 0.0)              # (H, tn) f32 (VPU, f32 -> v5e ok)

    # prediction = mf_vec @ wp_mf + h @ wp_mlp; MF part already in pred_mf,
    # MLP part is a sublane (axis 0) reduction -> lane-dense (1, tn).
    pred = pred_mf + jnp.sum(h * wp_mlp, axis=0, keepdims=True)
    out_ref[...] = pred[None, :, :]


def neumf_pallas(hw, items, w_comb, *, tn):
    """hw: (B,H,2) f32, items: (B,2E,N_pad) bf16, w_comb: (B,H+1,2E) bf16.

    Returns predictions of shape (B, 1, N_pad) f32.
    """
    B, twoE, N_pad = items.shape
    H = hw.shape[1]
    assert N_pad % tn == 0 and tn % 128 == 0
    assert w_comb.shape == (B, H + 1, twoE)

    cost = pl.CostEstimate(
        flops=2 * B * N_pad * (H + 1) * twoE + 4 * B * N_pad * H,
        transcendentals=0,
        bytes_accessed=(items.size * items.dtype.itemsize
                        + w_comb.size * w_comb.dtype.itemsize
                        + hw.size * hw.dtype.itemsize
                        + B * N_pad * 4))

    return pl.pallas_call(
        _neumf_kernel,
        out_shape=jax.ShapeDtypeStruct((B, 1, N_pad), jnp.float32),
        grid_spec=pltpu.PrefetchScalarGridSpec(
            num_scalar_prefetch=0,
            # NOTE(v7x): both axes are "parallel" so the 2 TensorCores shard
            # B * (N_pad // tn) steps; prefer shapes where that count is even.
            grid=(B, N_pad // tn),
            in_specs=[
                pl.BlockSpec((1, H, 2), lambda b, j: (b, 0, 0)),        # hw
                pl.BlockSpec((1, twoE, tn), lambda b, j: (b, 0, j)),    # items
                pl.BlockSpec((1, H + 1, twoE), lambda b, j: (b, 0, 0)), # w_comb
            ],
            out_specs=pl.BlockSpec((1, 1, tn), lambda b, j: (b, 0, j)),
        ),
        compiler_params=pltpu.CompilerParams(
            dimension_semantics=("parallel", "parallel")),
        cost_estimate=cost,
    )(hw, items, w_comb)


class NeuMFParams:
    """Deterministic parameter init matching the PyTorch module shapes."""

    def __init__(self, key, emb_size, user_num, item_num, layers=(64,)):
        assert len(layers) == 1, "module hard-codes self.layers = [64]"
        self.emb_size = emb_size
        H = layers[0]
        ks = jax.random.split(key, 8)
        s = 0.05
        self.mf_u_emb = jax.random.normal(ks[0], (user_num, emb_size),
                                          jnp.float32) * s
        self.mf_i_emb = jax.random.normal(ks[1], (item_num, emb_size),
                                          jnp.float32) * s
        # prefix_gen: Linear(3E -> E)   (only used when side_emb is given)
        self.prefix_w = jax.random.normal(ks[2], (3 * emb_size, emb_size),
                                          jnp.float32) * s
        self.prefix_b = jax.random.normal(ks[3], (emb_size,), jnp.float32) * s
        # mlp[0]: Linear(2E -> H), stored as (in, out)
        self.w1 = jax.random.normal(ks[4], (2 * emb_size, H), jnp.float32) * s
        self.b1 = jax.random.normal(ks[5], (H,), jnp.float32) * s
        # prediction: Linear(E + H -> 1, bias=False)
        self.wp = jax.random.normal(ks[6], (emb_size + H, 1), jnp.float32) * s


def neumf_forward(params, u_ids, i_ids, mlp_u_vectors, mlp_i_vectors,
                  side_emb=None):
    """
    u_ids:          (B,)       int32
    i_ids:          (B, N)     int32
    mlp_u_vectors:  (B, E)     float32
    mlp_i_vectors:  (B, N, E)  float32
    side_emb:       (B, 3E)    float32 or None
    returns dict {'prediction': (B, N)}
    """
    B, N = i_ids.shape
    E = params.emb_size
    H = params.w1.shape[1]

    # --- glue (plain JAX): embedding gathers + per-batch user-side hoists ---
    if side_emb is not None:
        mf_u = side_emb @ params.prefix_w + params.prefix_b      # (B, E)
    else:
        mf_u = params.mf_u_emb[u_ids]                            # (B, E)
    mf_i = params.mf_i_emb[i_ids]                                # (B, N, E)

    # user half of mlp[0] (identical across all N items) -> once per batch row
    w1u, w1i = params.w1[:E], params.w1[E:]                      # (E,H) each
    h_u = mlp_u_vectors @ w1u + params.b1                        # (B, H)

    # prediction weight split: cat([mf, h]) @ Wp == mf @ Wp_mf + h @ Wp_mlp
    wp_mf = params.wp[:E, 0]                                     # (E,)
    wp_mlp = params.wp[E:, 0]                                    # (H,)

    # MF branch folded into the kernel matmul: v = mf_u * wp_mf per batch row.
    v = mf_u * wp_mf[None, :]                                    # (B, E)

    # combined per-batch weight (H+1, 2E): rows 0..H-1 = [w1i^T | 0],
    # row H = [0 | v_b]   (columns 0..E-1 hit mlp_i rows, E..2E-1 hit mf_i).
    w_top = jnp.concatenate([w1i.T, jnp.zeros((H, E), jnp.float32)], axis=1)
    w_top_b = jnp.broadcast_to(w_top[None], (B, H, 2 * E))
    v_row = jnp.concatenate([jnp.zeros((B, 1, E), jnp.float32),
                             v[:, None, :]], axis=-1)            # (B, 1, 2E)
    w_comb = jnp.concatenate([w_top_b, v_row], axis=1).astype(jnp.bfloat16)

    # merged per-batch columns for the kernel: (B, H, 2) = [h_u | wp_mlp]
    hw = jnp.stack([h_u, jnp.broadcast_to(wp_mlp[None], (B, H))],
                   axis=-1).astype(jnp.float32)

    # merged, lane-major, bf16 item stream: (B, 2E, N_pad)
    tn = min(TN_MAX, _round_up(N, 128))
    N_pad = _round_up(N, tn)
    items = jnp.concatenate([mlp_i_vectors, mf_i], axis=-1)      # (B, N, 2E)
    items = jnp.swapaxes(items, 1, 2)                            # (B, 2E, N)
    pad = N_pad - N
    if pad:
        items = jnp.pad(items, ((0, 0), (0, 0), (0, pad)))
    items = items.astype(jnp.bfloat16)

    pred = neumf_pallas(hw, items, w_comb, tn=tn)                # (B, 1, N_pad)
    # Padded item columns carry garbage (relu(h_u)·wp_mlp); slice them off.
    return {'prediction': pred.reshape(B, N_pad)[:, :N]}


def _reference(params, u_ids, i_ids, mlp_u_vectors, mlp_i_vectors,
               side_emb=None):
    B, N = i_ids.shape
    E = params.emb_size
    if side_emb is not None:
        mf_u = side_emb @ params.prefix_w + params.prefix_b
        mf_u = jnp.broadcast_to(mf_u[:, None, :], (B, N, E))
    else:
        mf_u = params.mf_u_emb[jnp.broadcast_to(u_ids[:, None], (B, N))]
    mf_i = params.mf_i_emb[i_ids]
    mlp_u = jnp.broadcast_to(mlp_u_vectors[:, None, :], (B, N, E))
    mf_vec = mf_u * mf_i
    mlp_vec = jnp.concatenate([mlp_u, mlp_i_vectors], axis=-1)
    h = jnp.maximum(mlp_vec @ params.w1 + params.b1, 0.0)
    out = jnp.concatenate([mf_vec, h], axis=-1) @ params.wp
    return out.reshape(B, N)


if __name__ == "__main__":
    key = jax.random.PRNGKey(0)
    k_param, k_u, k_i, k_mu, k_mi, k_side = jax.random.split(key, 6)

    EMB = 32
    USER_NUM = 100
    ITEM_NUM = 200
    B, N = 2, 8

    params = NeuMFParams(k_param, EMB, USER_NUM, ITEM_NUM)

    u_ids = jax.random.randint(k_u, (B,), 0, USER_NUM, dtype=jnp.int32)
    i_ids = jax.random.randint(k_i, (B, N), 0, ITEM_NUM, dtype=jnp.int32)
    mlp_u_vectors = jax.random.normal(k_mu, (B, EMB), jnp.float32)
    mlp_i_vectors = jax.random.normal(k_mi, (B, N, EMB), jnp.float32)

    out = neumf_forward(params, u_ids, i_ids, mlp_u_vectors, mlp_i_vectors)
    pred = jax.block_until_ready(out['prediction'])

    ref = _reference(params, u_ids, i_ids, mlp_u_vectors, mlp_i_vectors)
    assert pred.shape == (B, N)
    # bf16 item/weight storage (f32 accumulation) -> loosened tolerance.
    assert jnp.allclose(pred, ref, atol=2e-2, rtol=2e-2), "mismatch vs reference"

    # also exercise the side_emb branch (prefix_gen) for completeness
    side_emb = jax.random.normal(k_side, (B, 3 * EMB), jnp.float32)
    out2 = neumf_forward(params, u_ids, i_ids, mlp_u_vectors, mlp_i_vectors,
                         side_emb=side_emb)
    pred2 = jax.block_until_ready(out2['prediction'])
    ref2 = _reference(params, u_ids, i_ids, mlp_u_vectors, mlp_i_vectors,
                      side_emb=side_emb)
    assert jnp.allclose(pred2, ref2, atol=2e-2, rtol=2e-2), "side_emb mismatch"

    # TODO(synk): nn.Dropout(p=0.2) is modeled in eval mode (identity); a
    # training-mode kernel would add pltpu.prng_random_bits masking.
    print("KERNEL_OK")
</pallas_src>

<mosaic_0001>
module attributes {stable_mosaic.version = 11 : i64} {
  func.func @_neumf_kernel(%arg0: i32, %arg1: i32, %arg2: memref<1x64x2xf32, #tpu.memory_space<vmem>>, %arg3: memref<1x64x128xbf16, #tpu.memory_space<vmem>>, %arg4: memref<1x65x64xbf16, #tpu.memory_space<vmem>>, %arg5: memref<1x1x128xf32, #tpu.memory_space<vmem>>) attributes {dimension_semantics = [#tpu.dimension_semantics<parallel>, #tpu.dimension_semantics<parallel>], iteration_bounds = array<i64: 2, 1>, scalar_prefetch = 0 : i64, scratch_operands = 0 : i64, tpu.core_type = #tpu.core_type<tc>, window_params = [{transform_indices = @transform_0, window_bounds = array<i64: 1, 64, 2>}, {transform_indices = @transform_1, window_bounds = array<i64: 1, 64, 128>}, {transform_indices = @transform_2, window_bounds = array<i64: 1, 65, 64>}, {transform_indices = @transform_3, window_bounds = array<i64: 1, 1, 128>}]} {
    %c0 = arith.constant 0 : index
    %c0_0 = arith.constant 0 : index
    %c0_1 = arith.constant 0 : index
    %0 = vector.load %arg3[%c0, %c0_0, %c0_1] : memref<1x64x128xbf16, #tpu.memory_space<vmem>>, vector<1x64x128xbf16>
    %1 = vector.shape_cast %0 : vector<1x64x128xbf16> to vector<64x128xbf16>
    %c0_2 = arith.constant 0 : index
    %c0_3 = arith.constant 0 : index
    %c0_4 = arith.constant 0 : index
    %2 = vector.load %arg4[%c0_2, %c0_3, %c0_4] : memref<1x65x64xbf16, #tpu.memory_space<vmem>>, vector<1x65x64xbf16>
    %3 = vector.shape_cast %2 : vector<1x65x64xbf16> to vector<65x64xbf16>
    %cst = arith.constant dense<0.000000e+00> : vector<65x128xf32>
    %4 = tpu.matmul %3, %1, %cst {dimension_numbers = #tpu.dot_dimension_numbers<[1], [0], [0], [1], [0, 0, 1, 1], [], []>} : vector<65x64xbf16>, vector<64x128xbf16>, vector<65x128xf32> -> vector<65x128xf32>
    %5 = vector.extract_strided_slice %4 {offsets = [0, 0], sizes = [64, 128], strides = [1, 1]} : vector<65x128xf32> to vector<64x128xf32>
    %6 = vector.extract_strided_slice %4 {offsets = [64, 0], sizes = [1, 128], strides = [1, 1]} : vector<65x128xf32> to vector<1x128xf32>
    %c0_5 = arith.constant 0 : index
    %c0_6 = arith.constant 0 : index
    %c0_7 = arith.constant 0 : index
    %7 = vector.load %arg2[%c0_5, %c0_6, %c0_7] : memref<1x64x2xf32, #tpu.memory_space<vmem>>, vector<1x64x2xf32>
    %8 = vector.shape_cast %7 : vector<1x64x2xf32> to vector<64x2xf32>
    %9 = vector.extract_strided_slice %8 {offsets = [0, 0], sizes = [64, 1], strides = [1, 1]} : vector<64x2xf32> to vector<64x1xf32>
    %10 = vector.extract_strided_slice %8 {offsets = [0, 1], sizes = [64, 1], strides = [1, 1]} : vector<64x2xf32> to vector<64x1xf32>
    %11 = vector.broadcast %9 : vector<64x1xf32> to vector<64x128xf32>
    %12 = arith.addf %5, %11 : vector<64x128xf32>
    %cst_8 = arith.constant 0.000000e+00 : f32
    %13 = vector.broadcast %cst_8 : f32 to vector<64x128xf32>
    %14 = arith.maximumf %12, %13 : vector<64x128xf32>
    %15 = vector.broadcast %10 : vector<64x1xf32> to vector<64x128xf32>
    %16 = arith.mulf %14, %15 : vector<64x128xf32>
    %cst_9 = arith.constant dense<0.000000e+00> : vector<128xf32>
    %17 = vector.multi_reduction <add>, %16, %cst_9 [0] : vector<64x128xf32> to vector<128xf32>
    %18 = vector.shape_cast %17 : vector<128xf32> to vector<1x128xf32>
    %19 = arith.addf %6, %18 : vector<1x128xf32>
    %20 = vector.shape_cast %19 : vector<1x128xf32> to vector<1x1x128xf32>
    %c0_10 = arith.constant 0 : index
    %c0_11 = arith.constant 0 : index
    %c0_12 = arith.constant 0 : index
    %21 = vector.load %arg5[%c0_10, %c0_11, %c0_12] : memref<1x1x128xf32, #tpu.memory_space<vmem>>, vector<1x1x128xf32>
    tpu.vector_store %arg5[%c0_10, %c0_11, %c0_12], %20 {strides = array<i32>} : memref<1x1x128xf32, #tpu.memory_space<vmem>>, vector<1x1x128xf32>,
    return
  }
  func.func @transform_0(%arg0: i32, %arg1: i32) -> (i32, i32, i32) {
    %c0_i32 = arith.constant 0 : i32
    %c0_i32_0 = arith.constant 0 : i32
    %c0_i32_1 = arith.constant 0 : i32
    return %arg0, %c0_i32, %c0_i32_0 : i32, i32, i32
  }
  func.func @transform_1(%arg0: i32, %arg1: i32) -> (i32, i32, i32) {
    %c0_i32 = arith.constant 0 : i32
    %c0_i32_0 = arith.constant 0 : i32
    return %arg0, %c0_i32, %arg1 : i32, i32, i32
  }
  func.func @transform_2(%arg0: i32, %arg1: i32) -> (i32, i32, i32) {
    %c0_i32 = arith.constant 0 : i32
    %c0_i32_0 = arith.constant 0 : i32
    %c0_i32_1 = arith.constant 0 : i32
    return %arg0, %c0_i32, %c0_i32_0 : i32, i32, i32
  }
  func.func @transform_3(%arg0: i32, %arg1: i32) -> (i32, i32, i32) {
    %c0_i32 = arith.constant 0 : i32
    %c0_i32_0 = arith.constant 0 : i32
    return %arg0, %c0_i32, %arg1 : i32, i32, i32
  }
}

</mosaic_0001>

<bundles_post_ra>
// kernel: tpu_custom_call.1
= control target key start
LH: loop header
LB: loop body
LE: loop exit
PB: predicated region body
PF: predicated region fallthrough
CT: control target
= control target key end

     0   :  { %8 = vsyncpa [#allocation3], 0  ;;  %s943_s0 = inlined_call_operand.vmem [shape: f32[2,64,2], index: 0, kind: input, shape index: {}]   ;;  %s944_s1 = inlined_call_operand.vmem [shape: bf16[2,64,128], index: 1, kind: input, shape index: {}]   ;;  %s945_s2 = inlined_call_operand.vmem [shape: bf16[2,65,64], index: 2, kind: input, shape index: {}]   ;;  %s946_s3 = inlined_call_operand.hbm [shape: f32[2,1,128], index: 3, kind: output, shape index: {}]  }
   0x1   :  { %10 = vsyncpa [#allocation3 + $0x1], 0  ;;  %s815_s12 = smov 0   ;;  %s817_s13 = smov 0  }
   0x2   :  { %s819_s14 = smov 0   ;;  %s821_s15 = smov 0  }
   0x3   :  { %s823_s16 = smov 0   ;;  %s825_s17 = smov 0  }
   0x4 LB: > { %s574_s18 = sadd.s32 4294967295, %s791_s17   ;;  %s575_s19 = sadd.s32 4294967294, %s791_s17   ;;  %s791_s17 = sphi %s825_s17, %s16_s17   ;;  %s787_s16 = sphi %s823_s16, %s953_s16   ;;  %s783_s15 = sphi %s821_s15, %s952_s15   ;;  %s779_s14 = sphi %s819_s14, %s951_s14   ;;  %s775_s13 = sphi %s817_s13, %s950_s13   ;;  %s771_s12 = sphi %s815_s12, %s949_s12  }
   0x5   : > { %s28_s20 = sadd.s32 1, %s787_s16  ;;  %s117_s21 = sadd.s32 1, %s779_s14 }
   0x6   : > { %p30_p0 = scmp.ge.s32.totalorder %s28_s20, 2  ;;  %p127_p1 = scmp.ne.s32.totalorder %s779_s14, %s775_s13 }
   0x7   : > { %p128_p2 = scmp.eq.s32.totalorder %s574_s18, 1  ;;  %p133_p3 = scmp.ne.s32.totalorder %s775_s13, %s771_s12 }
   0x8   : > { %s955_s20 = smov (%p30_p0, %s28_s20), 0  ;;  %p134_p5 = scmp.eq.s32.totalorder %s575_s19, 1 }
   0x9   : > { %p855_p4 = por %p128_p2, %p127_p1  ;;  %s112_s23 = ssub.s32 %s787_s16, %s955_s20 }
   0xa   : > { %p578_p6 = scmp.ge.s32.totalorder %s791_s17, 1  ;;  %p115_p7 = scmp.eq.s32.totalorder %s112_s23, 0 }
   0xb   : > { %p862_p8 = por %p134_p5, %p133_p3  ;;  %p179_p9 = scmp.lt.s32.totalorder %s791_s17, 3 }
   0xc   : > { %s868_s25 = scalar_select %p115_p7, %s779_s14, %s117_s21  }
   0xd   : > { %p180_p10 = pnand %p578_p6, %p179_p9 }
   0xe   : > { %p215_p11 = scmp.lt.s32.totalorder (!%p180_p10), %s783_s15, 1  ;;  %s213_s18 = sand.u32 (!%p180_p10), 1, %s775_s13  }
   0xf   : > { %183 = sbr.rel (%p180_p10) target bundleno = 212 (0xd4), region = 32  ;;  %s476_s23 = scalar_lea.hbm (!%p180_p10), %s946_s3, %s783_s15 }
  0x10   : > { %s467_s29 = scalar_lea.sflag (!%p180_p10), [#allocation3], %s213_s18 }
  0x14   : > { %v793_v0 = vmov 0   ;;  %s874_s26 = scalar_select %p215_p11, %s783_s15, 1  ;;  %v794_v10 = vmov 1   ;;  %vm298_vm0 = vcmask 523264  }
  0x15   : > { %704 = vset.pattern.permute.xlu1 %v793_v0  ;;  %703 = vset.pattern.permute.xlu0 %v793_v0  ;;  %s733_s15 = scalar_lea.hbm %s946_s3, 2 }
  0x16   : > { %705 = vset.pattern.permute.xlu2 %v793_v0  ;;  %s623_s27 = sshll.u32 %s874_s26, 6  ;;  %s624_s28 = sshll.u32 %s874_s26, 5 }
  0x17   : > { %s882_s4 = scalar_lea.vmem %s943_s0, %s623_s27  ;;  %s227_s7 = scalar_lea.vmem %s944_s1, %s624_s28 }
  0x18   : > { %v349_v1 = vld [vmem:[%s882_s4 + $0x10] sm:$0xff]  ;;  %v347_v2 = vld [vmem:[%s882_s4] sm:$0xff]  ;;  %v628_v3 = vld [vmem:[%s227_s7 + $0x18] sm:$0xff]  ;;  %s645_s8 = smul.u32 36, %s874_s26  ;;  %s214_s26 = scalar_lea.vmem [#allocation2], %s213_s18 }
  0x19   : > { %367 = vperm.xlu1 %704, %v349_v1   ;;  %357 = vperm.xlu0 %703, %v347_v2   ;;  %v627_v4 = vld [vmem:[%s227_s7 + $0x10] sm:$0xff]  ;;  %v351_v5 = vld [vmem:[%s882_s4 + $0x20] sm:$0xff]  ;;  %v350_v6 = vld [vmem:[%s882_s4 + $0x18] sm:$0xff]  ;;  %s478_s27 = sshll.u32 %s214_s26, 4  ;;  %s480_s28 = sshll.u32 %s476_s23, 4  ;;  %s479_s27 = int_to_ptr.vmem [resolvable:$true] %s478_s27  ;;  %s481_s28 = int_to_ptr.hbm [resolvable:$true] %s480_s28 }
  0x1a   : > { %318 = vmatpush.bf16.msra.mxu0 %v628_v3  ;;  %633 = vmatpush.bf16.msra.mxu1 %v628_v3  ;;  %v348_v7 = vld [vmem:[%s882_s4 + $0x8] sm:$0xff]  ;;  %v625_v9 = vld [vmem:[%s227_s7] sm:$0xff]  ;;  %s232_s11 = scalar_lea.vmem %s945_s2, %s645_s8  ;;  %v353_v18 = vld [vmem:[%s882_s4 + $0x30] sm:$0xff]  ;;  %s727_s30 = sshra.s32 %s481_s28, 4  ;;  %s728_s30 = int_to_ptr.hbm [resolvable:$true] %s727_s30 }
  0x1b   : > { %634 = vmatpush.bf16.msra.mxu2 %v628_v3  ;;  %635 = vmatpush.bf16.msra.mxu3 %v628_v3  ;;  %v626_v8 = vld [vmem:[%s227_s7 + $0x8] sm:$0xff]  ;;  %v629_v11 = vld [vmem:[%s232_s11] sm:$0xff]  ;;  %v631_v13 = vld [vmem:[%s232_s11 + $0x10] sm:$0xff]  ;;  %p734_p1 = scmp.lt.s32.totalorder %s728_s30, %s946_s3 }
  0x1c   : > { %377 = vperm.xlu2 %705, %v351_v5   ;;  %v630_v12 = vld [vmem:[%s232_s11 + $0x8] sm:$0xff]  ;;  %v632_v14 = vld [vmem:[%s232_s11 + $0x18] sm:$0xff]  ;;  %v250_v16 = vld [vmem:[%s232_s11 + $0x20] sm:$0x1] }
  0x1d   : > { %v352_v15 = vld [vmem:[%s882_s4 + $0x28] sm:$0xff]  ;;  %v268_v17 = vunpack.c.l.b16 %v250_v16  ;;  %v354_v20 = vld [vmem:[%s882_s4 + $0x38] sm:$0xff]  ;;  %s729_s4 = scalar_lea.hbm %s728_s30, 1 }
  0x1e   : > { %319 = vmatpush.bf16.msra.mxu0 %v627_v4  ;;  %636 = vmatpush.bf16.msra.mxu1 %v627_v4  ;;  %p730_p12 = scmp.ne.s32.totalorder %s728_s30, %s729_s4  ;;  %p735_p2 = scmp.lt.s32.totalorder %s733_s15, %s729_s4 }
  0x1f   : > { %637 = vmatpush.bf16.msra.mxu2 %v627_v4  ;;  %638 = vmatpush.bf16.msra.mxu3 %v627_v4  ;;  %v273_v19 = vpack.c.b16 %v268_v17, %v268_v17 }
  0x20   : > { %p731_p13 = pnand %p730_p12, %p855_p4  ;;  %p736_p3 = por %p735_p2, %p734_p1 }
  0x21   : > { %372 = vperm.xlu1 %704, %v350_v6   ;;  %362 = vperm.xlu0 %703, %v348_v7  }
  0x22   : > { %320 = vmatpush.bf16.msra.mxu0 %v626_v8  ;;  %639 = vmatpush.bf16.msra.mxu1 %v626_v8  ;;  %p732_p0 = pneg %p731_p13 }
  0x23   : > { %640 = vmatpush.bf16.msra.mxu2 %v626_v8  ;;  %641 = vmatpush.bf16.msra.mxu3 %v626_v8 }
  0x24   : > { %706 = vset.pattern.permute.xlu2 %v794_v10  ;;  %p737_p5 = pnand %p736_p3, %p732_p0 }
  0x25   : > { %412 = vperm.xlu2 %706, %v347_v2  }
  0x26   : > { %321 = vmatpush.bf16.msra.mxu0 %v625_v9  ;;  %642 = vmatpush.bf16.msra.mxu1 %v625_v9 }
  0x27   : > { %643 = vmatpush.bf16.msra.mxu2 %v625_v9  ;;  %644 = vmatpush.bf16.msra.mxu3 %v625_v9 }
  0x29   : > { %616 = vmatmul.msk.bf16.vlgmr.msra.gmra.mxu0 %vm298_vm0, %v629_v11  ;;  %617 = vmatmul.msk.bf16.vlgmr.msra.gmra.mxu1 %vm298_vm0, %v630_v12 }
  0x2a   : > { %618 = vmatmul.msk.bf16.vlgmr.msra.gmra.mxu2 %vm298_vm0, %v631_v13  ;;  %619 = vmatmul.msk.bf16.vlgmr.msra.gmra.mxu3 %vm298_vm0, %v632_v14 }
  0x2b   : > { %708 = vset.pattern.permute.xlu1 %v794_v10  ;;  %707 = vset.pattern.permute.xlu0 %v794_v10 }
  0x2c   : > { %420 = vperm.xlu1 %708, %v349_v1   ;;  %416 = vperm.xlu0 %707, %v348_v7  }
  0x2d   : > { %709 = vset.pattern.permute.xlu2 %v793_v0 }
  0x2e   : > { %382 = vperm.xlu2 %709, %v352_v15  }
  0x34   : > { %424 = vperm.xlu1 %708, %v350_v6   ;;  %428 = vperm.xlu0 %707, %v351_v5  }
  0x36   : > { %387 = vperm.xlu2 %709, %v353_v18  }
  0x3a   : > { %620 = vmatmul.msk.bf16.gmra.mxu3 %vm298_vm0, %v273_v19 }
  0x3c   : > { %436 = vperm.xlu0 %707, %v353_v18   ;;  %710 = vset.pattern.permute.xlu1 %v793_v0 }
  0x3d   : > { %392 = vperm.xlu1 %710, %v354_v20  }
  0x3e   : > { %711 = vset.pattern.permute.xlu2 %v794_v10 }
  0x3f   : > { %432 = vperm.xlu2 %711, %v352_v15  }
  0x45   : > { %712 = vset.pattern.permute.xlu1 %v794_v10 }
  0x46   : > { %440 = vperm.xlu1 %712, %v354_v20  }
  0x76   : > { %v378_v22 = vpop.permute.xlu2 %377 }
  0x7f   : > { %v413_v25 = vpop.permute.xlu2 %412 }
  0x88   : > { %v383_v28 = vpop.permute.xlu2 %382 }
  0x8b   : > { %v368_v21 = vpop.permute.xlu1 %367  ;;  %v358_v23 = vpop.permute.xlu0 %357 }
  0x90   : > { %v388_v43 = vpop.permute.xlu2 %387 }
  0x93   : > { %v373_v24 = vpop.permute.xlu1 %372  ;;  %v363_v26 = vpop.permute.xlu0 %362 }
  0x99   : > { %v433_v62 = vpop.permute.xlu2 %432 }
  0x9e   : > { %v421_v27 = vpop.permute.xlu1 %420  ;;  %v417_v31 = vpop.permute.xlu0 %416 }
  0xa6   : > { %v323_v29 = vpop.f32.mrf.mxu0  ;;  %v328_v30 = vpop.f32.mrf.mxu1 }
  0xa7   : > { %v425_v32 = vpop.permute.xlu1 %424  ;;  %v395_v33 = vadd.f32 %v358_v23, %v323_v29  ;;  %v397_v34 = vadd.f32 %v368_v21, %v328_v30  ;;  %v429_v44 = vpop.permute.xlu0 %428 }
  0xa9   : > { %v403_v39 = vmax.f32 %v395_v33, 0.0  ;;  %v405_v42 = vmax.f32 %v397_v34, 0.0 }
  0xab   : > { %v443_v48 = vmul.f32 %v413_v25, %v403_v39  ;;  %v445_v51 = vmul.f32 %v421_v27, %v405_v42 }
  0xad   : > { %v333_v35 = vpop.f32.mrf.mxu2  ;;  %v338_v36 = vpop.f32.mrf.mxu3 }
  0xae   : > { %v325_v37 = vpop.f32.mrf.mxu0  ;;  %v330_v38 = vpop.f32.mrf.mxu1  ;;  %v399_v45 = vadd.f32 %v378_v22, %v333_v35  ;;  %v401_v55 = vadd.f32 %v388_v43, %v338_v36 }
  0xaf   : > { %v396_v40 = vadd.f32 %v363_v26, %v325_v37  ;;  %v398_v41 = vadd.f32 %v373_v24, %v330_v38  ;;  %v393_v47 = vpop.permute.xlu1 %392  ;;  %v437_v2 = vpop.permute.xlu0 %436 }
  0xb0   : > { %v407_v54 = vmax.f32 %v399_v45, 0.0  ;;  %v409_v0 = vmax.f32 %v401_v55, 0.0 }
  0xb1   : > { %v404_v46 = vmax.f32 %v396_v40, 0.0  ;;  %v406_v50 = vmax.f32 %v398_v41, 0.0 }
  0xb2   : > { %v447_v63 = vmul.f32 %v429_v44, %v407_v54  ;;  %v449_v8 = vmul.f32 %v437_v2, %v409_v0 }
  0xb3   : > { %v444_v49 = vmul.f32 %v417_v31, %v404_v46  ;;  %v446_v58 = vmul.f32 %v425_v32, %v406_v50 }
  0xb5   : > { %v335_v52 = vpop.f32.mrf.mxu2  ;;  %v340_v53 = vpop.f32.mrf.mxu3  ;;  %v451_v56 = vadd.f32 %v444_v49, %v443_v48 }
  0xb6   : > { %v400_v57 = vadd.f32 %v383_v28, %v335_v52  ;;  %v402_v61 = vadd.f32 %v393_v47, %v340_v53 }
  0xb7   : > { %v452_v59 = vadd.f32 %v451_v56, %v445_v51 }
  0xb8   : > { %v408_v60 = vmax.f32 %v400_v57, 0.0  ;;  %v410_v3 = vmax.f32 %v402_v61, 0.0  ;;  %v441_v6 = vpop.permute.xlu1 %440 }
  0xb9   : > { %v453_v1 = vadd.f32 %v452_v59, %v446_v58 }
  0xba   : > { %v448_v4 = vmul.f32 %v433_v62, %v408_v60  ;;  %v450_v10 = vmul.f32 %v441_v6, %v410_v3 }
  0xbb   : > { %v454_v5 = vadd.f32 %v453_v1, %v447_v63 }
  0xbd   : > { %v343_v7 = vpop.f32.mrf.mxu3  ;;  %v455_v9 = vadd.f32 %v454_v5, %v448_v4 }
  0xbf   : > { %v456_v11 = vadd.f32 %v455_v9, %v449_v8 }
  0xc1   : > { %v457_v12 = vadd.f32 %v456_v11, %v450_v10 }
  0xc3   : > { %v458_v13 = vrot.slane %v457_v12, 4 }
  0xc5   : > { %v345_v14 = vpop.f32.mrf.mxu3  ;;  %v459_v15 = vadd.f32 %v458_v13, %v457_v12 }
  0xc7   : > { %v460_v16 = vrot.slane %v459_v15, 2 }
  0xc9   : > { %v461_v17 = vadd.f32 %v460_v16, %v459_v15 }
  0xcb   : > { %v462_v18 = vrot.slane %v461_v17, 1 }
  0xcd   : > { %v463_v19 = vadd.f32 %v462_v18, %v461_v17 }
  0xcf   : > { %v464_v20 = vadd.f32 %v463_v19, %v343_v7 }
  0xd1   : > { %465 = vst [vmem:[%s214_s26] sm:$0x1] %v464_v20 }
  0xd2   : > { %740 = shalt.err (!%p737_p5)
}
  0xd3   : > { %646 = dma.vmem_to_hbm [thread:$0]  (%p855_p4), %s479_s27, 16, %s481_s28, %s467_s29  }
  0xd4 PF: > { %p652_p6 = scmp.ge.s32.totalorder %s791_s17, 2  ;;  %s492_s9 = sand.u32 1, %s771_s12  }
  0xd5   : > { %s493_s10 = scalar_lea.sflag [#allocation3], %s492_s9 }
  0xd6   : > { %p649_p7 = pnand %p652_p6, %p862_p8 }
  0xd8   : > { %p650_p9 = pneg %p649_p7 }
  0xda   : > { %766 = dma.done.wait (%p650_p9), %s493_s10, 16  }
  0xdb   : > { %768 = vsyncadd (%p650_p9), %s493_s10, 4294967280  ;;  %s16_s17 = sadd.s32 1, %s791_s17   ;;  %s949_s12 = smov %s775_s13 }
  0xdc   : > { %p13_p10 = scmp.ge.s32.totalorder %s16_s17, 4   ;;  %s950_s13 = smov %s779_s14 }
  0xdd   : > { %s951_s14 = smov %s868_s25  ;;  %s952_s15 = smov %s787_s16 }
  0xde   : > { %s953_s16 = smov %s955_s20  ;;  %15 = sbr.rel (!%p13_p10) target bundleno = 4 (0x4), region = 73 }
  0xe3   :  { %498 = vsyncpa [#allocation3], 1 }
  0xe4   :  { %500 = vsyncpa [#allocation3 + $0x1], 1 }

</bundles_post_ra>
